<compile_context>
chip_gen: v7x
topology: tpu7x:2x2x1
jax: 0.10.0
libtpu: 0.0.40
codegen_flags: <defaults>
</compile_context>

<pallas_src>
import jax
import jax.numpy as jnp
from jax.experimental import pallas as pl
from jax.experimental.pallas import tpu as pltpu


def _cat_relu_kernel(x1_ref, x2_ref, out_ref):
    m, k = x1_ref.shape                       # (2, 3) for the module's inputs

    # relu on the unique 9 elements only (hoisted before any broadcast).
    r1 = jnp.maximum(x1_ref[...], 0.0)        # (m, k)
    r2 = jnp.maximum(x2_ref[...], 0.0)        # (1, k)

    # Broadcasts emitted once.
    r2_two = jnp.broadcast_to(r2, (2, k))             # (2, k)
    r2_all = jnp.broadcast_to(r2, (2 * m + 2, k))     # (2m+2, k)

    # Left half (lanes [0:k]): rows 0..m-1 = r1, rows m..2m-1 = r1 again,
    # rows 2m..2m+1 = r2.  Right half (lanes [k:2k]): every row is r2.
    out_ref[0:m, 0:k] = r1
    out_ref[m:2 * m, 0:k] = r1
    out_ref[2 * m:2 * m + 2, 0:k] = r2_two
    out_ref[0:2 * m + 2, k:2 * k] = r2_all


def model_forward(x1, x2):
    """x1: (1, M, K) float32, x2: (1, K) float32 -> flat ((2M+2)*2K,) vector."""
    b, m, k = x1.shape
    b2, k2 = x2.shape
    assert b == 1 and b2 == 1 and k == k2, "shapes must match the module's inputs"

    out_shape = (2 * m + 2, 2 * k)
    out2d = pl.pallas_call(
        _cat_relu_kernel,
        out_shape=jax.ShapeDtypeStruct(out_shape, x1.dtype),
        in_specs=[
            pl.BlockSpec(memory_space=pltpu.MemorySpace.VMEM),
            pl.BlockSpec(memory_space=pltpu.MemorySpace.VMEM),
        ],
        out_specs=pl.BlockSpec(memory_space=pltpu.MemorySpace.VMEM),
    )(x1.reshape(m, k), x2)

    # glue: row-major flatten == torch .view(-1) on the (1, 2M+2, 2K) tensor
    return out2d.reshape(-1)


def _reference(x1, x2):
    x2b = jnp.broadcast_to(x2[:, None, :], x1.shape)
    v1 = jnp.concatenate([x1, x2b], axis=2)
    v3 = jnp.concatenate([x2, x2], axis=1)[:, None, :]
    v4 = jnp.concatenate([v1, v3], axis=1)
    v5 = jnp.concatenate([v4, v3], axis=1)
    v6 = jnp.concatenate([v1, v5], axis=1)
    return jnp.maximum(v6, 0.0).reshape(-1)


if __name__ == "__main__":
    key = jax.random.PRNGKey(0)
    k1, k2 = jax.random.split(key)
    x1 = jax.random.normal(k1, (1, 2, 3), dtype=jnp.float32)   # like torch.randn(1, 2, 3)
    x2 = jax.random.normal(k2, (1, 3), dtype=jnp.float32)      # like torch.randn(1, 3)

    out = model_forward(x1, x2)
    out = jax.block_until_ready(out)

    ref = _reference(x1, x2)
    assert out.shape == ref.shape == (36,)
    assert jnp.allclose(out, ref, atol=1e-6), "mismatch vs pure-JAX reference"

    print("KERNEL_OK")
</pallas_src>

<mosaic_0001>
module attributes {stable_mosaic.version = 11 : i64} {
  func.func @_cat_relu_kernel(%arg0: memref<2x3xf32, #tpu.memory_space<vmem>>, %arg1: memref<1x3xf32, #tpu.memory_space<vmem>>, %arg2: memref<6x6xf32, #tpu.memory_space<vmem>>) attributes {dimension_semantics = [], scalar_prefetch = 0 : i64, scratch_operands = 0 : i64, tpu.core_type = #tpu.core_type<tc>} {
    %c0 = arith.constant 0 : index
    %c0_0 = arith.constant 0 : index
    %0 = vector.load %arg0[%c0, %c0_0] : memref<2x3xf32, #tpu.memory_space<vmem>>, vector<2x3xf32>
    %cst = arith.constant 0.000000e+00 : f32
    %1 = vector.broadcast %cst : f32 to vector<2x3xf32>
    %2 = arith.maximumf %0, %1 : vector<2x3xf32>
    %c0_1 = arith.constant 0 : index
    %c0_2 = arith.constant 0 : index
    %3 = vector.load %arg1[%c0_1, %c0_2] : memref<1x3xf32, #tpu.memory_space<vmem>>, vector<1x3xf32>
    %cst_3 = arith.constant 0.000000e+00 : f32
    %4 = vector.broadcast %cst_3 : f32 to vector<1x3xf32>
    %5 = arith.maximumf %3, %4 : vector<1x3xf32>
    %6 = vector.shape_cast %5 : vector<1x3xf32> to vector<1x3xf32>
    %7 = vector.broadcast %6 : vector<1x3xf32> to vector<2x3xf32>
    %8 = vector.shape_cast %5 : vector<1x3xf32> to vector<1x3xf32>
    %9 = vector.broadcast %8 : vector<1x3xf32> to vector<6x3xf32>
    %c0_4 = arith.constant 0 : index
    %c0_5 = arith.constant 0 : index
    %10 = vector.load %arg2[%c0_4, %c0_5] : memref<6x6xf32, #tpu.memory_space<vmem>>, vector<2x3xf32>
    tpu.vector_store %arg2[%c0_4, %c0_5], %2 {strides = array<i32>} : memref<6x6xf32, #tpu.memory_space<vmem>>, vector<2x3xf32>,
    %c2 = arith.constant 2 : index
    %c0_6 = arith.constant 0 : index
    %11 = vector.load %arg2[%c2, %c0_6] : memref<6x6xf32, #tpu.memory_space<vmem>>, vector<2x3xf32>
    tpu.vector_store %arg2[%c2, %c0_6], %2 {strides = array<i32>} : memref<6x6xf32, #tpu.memory_space<vmem>>, vector<2x3xf32>,
    %c4 = arith.constant 4 : index
    %c0_7 = arith.constant 0 : index
    %12 = vector.load %arg2[%c4, %c0_7] : memref<6x6xf32, #tpu.memory_space<vmem>>, vector<2x3xf32>
    tpu.vector_store %arg2[%c4, %c0_7], %7 {strides = array<i32>} : memref<6x6xf32, #tpu.memory_space<vmem>>, vector<2x3xf32>,
    %c0_8 = arith.constant 0 : index
    %c3 = arith.constant 3 : index
    %13 = vector.load %arg2[%c0_8, %c3] : memref<6x6xf32, #tpu.memory_space<vmem>>, vector<6x3xf32>
    tpu.vector_store %arg2[%c0_8, %c3], %9 {strides = array<i32>} : memref<6x6xf32, #tpu.memory_space<vmem>>, vector<6x3xf32>,
    return
  }
}

</mosaic_0001>

<bundles_post_ra>
// kernel: tpu_custom_call.1
= control target key start
LH: loop header
LB: loop body
LE: loop exit
PB: predicated region body
PF: predicated region fallthrough
CT: control target
= control target key end

     0   :  { %7 = vsyncpa [#allocation3], 0  ;;  %s154_s0 = inlined_call_operand.hbm [shape: f32[2,3], index: 0, kind: input, shape index: {}]   ;;  %s155_s1 = inlined_call_operand.vmem [shape: f32[1,3], index: 1, kind: input, shape index: {}]   ;;  %s156_s2 = inlined_call_operand.hbm [shape: f32[6,6], index: 2, kind: output, shape index: {}]  }
   0x1   :  { %8 = vsyncpa [#allocation4], 0  ;;  %s109_s9 = smov [#allocation2]   ;;  %s61_s13 = scalar_lea.hbm %s154_s0, 32 }
   0x2   :  { %s15_s10 = sshll.u32 %s109_s9, 4  ;;  %p62_p0 = scmp.ne.s32.totalorder %s154_s0, %s61_s13  ;;  %s16_s10 = int_to_ptr.vmem [resolvable:$true] %s15_s10 }
   0x3   :  { %p65_p1 = scmp.lt.u32.totalorder %s61_s13, %s154_s0 }
   0x5   :  { %p67_p2 = pnand %p65_p1, %p62_p0 }
   0x7   :  { %70 = shalt.err (!%p67_p2)
}
   0x8   :  { %s71_s18 = scalar_lea.vmem %s16_s10, 32  ;;  %p76_p4 = scmp.lt.s32.totalorder %s16_s10, %s16_s10 }
   0x9   :  { %p72_p3 = scmp.ne.s32.totalorder %s16_s10, %s71_s18  ;;  %p77_p5 = scmp.lt.s32.totalorder %s71_s18, %s71_s18 }
   0xb   :  { %p78_p6 = por %p77_p5, %p76_p4 }
   0xd   :  { %p79_p7 = pnand %p78_p6, %p72_p3 }
   0xf   :  { %82 = shalt.err (!%p79_p7)
}
  0x10   :  { %18 = dma.hbm_to_vmem [thread:$0]  %s154_s0, 32, %s16_s10, [#allocation3]  }
  0x11   :  { %105 = dma.done.wait [#allocation3], 32  }
  0x12   :  { %106 = vsyncadd [#allocation3], 4294967264  ;;  %v29_v0 = vlaneseq  ;;  %v24_v3 = vld [vmem:[#allocation2] sm:$0x3]  ;;  %vm34_vm0 = vcmask 17408   ;;  %s110_s23 = smov 3  }
  0x13   :  { %v26_v4 = vld [vmem:[%s155_s1] sm:$0x1]  ;;  %v25_v5 = vmax.f32 %v24_v3, 0.0  ;;  %s111_s0 = smov [#allocation5]   ;;  %vm41_vm1 = vcmask 46104  }
  0x14   :  { %v30_v1 = vshrl.u32 %v29_v0, 7  ;;  %v27_v6 = vmax.f32 %v26_v4, 0.0  ;;  %s49_s24 = sshll.u32 %s111_s0, 4  ;;  %s50_s24 = int_to_ptr.vmem [resolvable:$true] %s49_s24 }
  0x15   :  { %35 = vst.msk [vmem:[#allocation5] sm:$0x3] %vm34_vm0, %v25_v5  ;;  %36 = vst.msk [vmem:[#allocation5 + $0x2] sm:$0x3] %vm34_vm0, %v25_v5  ;;  %s83_s25 = scalar_lea.vmem %s50_s24, 128  ;;  %p88_p9 = scmp.lt.s32.totalorder %s50_s24, %s50_s24 }
  0x16   :  { %v31_v2 = vsub.s32 0, %v30_v1  ;;  %p84_p8 = scmp.ne.s32.totalorder %s50_s24, %s83_s25  ;;  %p89_p10 = scmp.lt.s32.totalorder %s83_s25, %s83_s25 }
  0x18   :  { %v32_v7 = vrot.slane %v27_v6, %v31_v2  ;;  %p90_p11 = por %p89_p10, %p88_p9 }
  0x1a   :  { %37 = vst.msk [vmem:[#allocation5 + $0x4] sm:$0x3] %vm34_vm0, %v32_v7  ;;  %38 = vrot.lane.b32.xlu0 %v32_v7, %s110_s23  ;;  %p91_p12 = pnand %p90_p11, %p84_p8 }
  0x8c   :  { %v39_v8 = vpop.permute.xlu0 %38 }
  0x8d   :  { %42 = vst.msk [vmem:[#allocation5] sm:$0x3f] %vm41_vm1, %v39_v8 }
  0x8e   :  { %94 = shalt.err (!%p91_p12)
}
  0x8f   :  { %s95_s27 = scalar_lea.hbm %s156_s2, 128 }
  0x90   :  { %p96_p13 = scmp.ne.s32.totalorder %s156_s2, %s95_s27  ;;  %p99_p0 = scmp.lt.u32.totalorder %s95_s27, %s156_s2 }
  0x92   :  { %p101_p1 = pnand %p99_p0, %p96_p13 }
  0x94   :  { %104 = shalt.err (!%p101_p1)
}
  0x95   :  { %52 = dma.vmem_to_hbm [thread:$0]  %s50_s24, 128, %s156_s2, [#allocation4]  }
  0x96   :  { %107 = dma.done.wait [#allocation4], 128  }
  0x97   :  { %108 = vsyncadd [#allocation4], 4294967168 }
  0x98   :  { %56 = vsyncpa [#allocation3], 1 }
  0x99   :  { %57 = vsyncpa [#allocation4], 1 }

</bundles_post_ra>
